<compile_context>
chip_gen: v7x
topology: tpu7x:2x2x1
jax: 0.10.0
libtpu: 0.0.40
codegen_flags: <defaults>
</compile_context>

<pallas_src>
import functools

import jax
import jax.numpy as jnp
from jax.experimental import pallas as pl
from jax.experimental.pallas import tpu as pltpu


def _round_up(x, m):
    return ((x + m - 1) // m) * m


# ----------------------------------------------------------------------------
# Fused kernel: all hidden layers + final linear, one batch tile per grid step
# ----------------------------------------------------------------------------
def make_fused_mlp_kernel(num_hidden, use_bf16=False):
    """Builds a kernel with signature:
       kernel(x_ref,
              (w_i, b_i, scale_i, shift_i, wfinal_i) * num_hidden,
              bfinal_ref, o_ref)
    """

    def kernel(*refs):
        x_ref = refs[0]
        bf_ref = refs[1 + 5 * num_hidden]
        o_ref = refs[2 + 5 * num_hidden]

        def mxu_in(a):
            # bf16 to the MXU (v6e/v7x fast path); accumulation stays f32.
            return a.astype(jnp.bfloat16) if use_bf16 else a

        h = x_ref[...]
        acc = None
        for i in range(num_hidden):
            w_ref, b_ref, s_ref, sh_ref, wf_ref = refs[1 + 5 * i: 1 + 5 * (i + 1)]
            # Linear
            h = jnp.dot(mxu_in(h), mxu_in(w_ref[...]),
                        preferred_element_type=jnp.float32)
            # bias -> relu (relu_last=False: relu BEFORE batch norm)
            h = jnp.maximum(h + b_ref[...], 0.0)
            # folded eval-mode BatchNorm1d (per-feature affine)
            h = h * s_ref[...] + sh_ref[...]
            # dropout p=0.0 (eval) -> identity
            # contribution of this layer's activation to the final linear
            part = jnp.dot(mxu_in(h), mxu_in(wf_ref[...]),
                           preferred_element_type=jnp.float32)
            acc = part if acc is None else acc + part
        o_ref[...] = (acc + bf_ref[...]).astype(o_ref.dtype)

    return kernel


# ----------------------------------------------------------------------------
# Wrapper around pallas_call
# ----------------------------------------------------------------------------
def mlp_forward(x, params, *, bm=128, use_bf16=False):
    """Fused MLP forward. x: [N, in_channels] float32."""
    N, in_c = x.shape
    hidden = params["hidden"]            # list of (w[K,M], b[1,M], scale[1,M], shift[1,M])
    wf_chunks = params["final_w_chunks"]  # list of [H, out_c] chunks of the final weight
    bf = params["final_b"]                # (1, out_c)
    out_c = bf.shape[-1]
    num_hidden = len(hidden)

    # Batch tile: big (>=128) for throughput, clamped + 8-aligned for tiny N.
    bm_eff = min(bm, _round_up(N, 8))
    grid = (pl.cdiv(N, bm_eff),)

    in_specs = [pl.BlockSpec((bm_eff, in_c), lambda i: (i, 0))]
    args = [x]
    flops = 0
    param_bytes = 0
    for (w, b, scale, shift), wf in zip(hidden, wf_chunks):
        k, m = w.shape
        in_specs += [
            pl.BlockSpec((k, m), lambda i: (0, 0)),        # layer weight (resident)
            pl.BlockSpec((1, m), lambda i: (0, 0)),        # bias
            pl.BlockSpec((1, m), lambda i: (0, 0)),        # bn scale
            pl.BlockSpec((1, m), lambda i: (0, 0)),        # bn shift
            pl.BlockSpec((m, out_c), lambda i: (0, 0)),    # final-weight chunk
        ]
        args += [w, b, scale, shift, wf]
        flops += 2 * N * k * m + 2 * N * m * out_c
        param_bytes += (k * m + 3 * m + m * out_c) * 4
    in_specs.append(pl.BlockSpec((1, out_c), lambda i: (0, 0)))  # final bias
    args.append(bf)

    cost = pl.CostEstimate(
        flops=flops,
        transcendentals=0,
        bytes_accessed=x.size * 4 + param_bytes + out_c * 4 + N * out_c * 4,
    )

    kernel = make_fused_mlp_kernel(num_hidden, use_bf16=use_bf16)

    return pl.pallas_call(
        kernel,
        out_shape=jax.ShapeDtypeStruct((N, out_c), jnp.float32),
        grid=grid,
        in_specs=in_specs,
        out_specs=pl.BlockSpec((bm_eff, out_c), lambda i: (i, 0)),
        compiler_params=pltpu.CompilerParams(
            dimension_semantics=("parallel",),        # megacore-shard batch axis
            vmem_limit_bytes=32 * 1024 * 1024,        # safe on v5e/v6e/v7x, headroom for bigger bm
        ),
        cost_estimate=cost,
    )(*args)


# ----------------------------------------------------------------------------
# Parameter construction (deterministic, PyTorch-like shapes)
# ----------------------------------------------------------------------------
def init_mlp_params(key, in_channels, hidden_channels, out_channels, num_layers):
    """Parameters matching MLP.__init__ shapes.

    Linear weights stored transposed ([in, out]); eval-mode BatchNorm1d folded
    into per-feature (scale, shift); bias/scale/shift pre-reshaped to (1, M);
    final weight pre-split into per-hidden-layer chunks (skip-concat fusion).
    """
    eps = 1e-5
    params = {"hidden": []}

    dims = [in_channels] + [hidden_channels] * (num_layers - 1)
    for li in range(num_layers - 1):
        key, k_w, k_b, k_g, k_be, k_m, k_v = jax.random.split(key, 7)
        fan_in = dims[li]
        bound = 1.0 / jnp.sqrt(fan_in)
        # PyTorch Linear weight is (out, in); store transposed (in, out).
        w = jax.random.uniform(k_w, (fan_in, hidden_channels), jnp.float32,
                               -bound, bound)
        b = jax.random.uniform(k_b, (hidden_channels,), jnp.float32, -bound, bound)
        gamma = jax.random.uniform(k_g, (hidden_channels,), jnp.float32, 0.5, 1.5)
        beta = jax.random.uniform(k_be, (hidden_channels,), jnp.float32, -0.5, 0.5)
        running_mean = jax.random.uniform(k_m, (hidden_channels,), jnp.float32,
                                          -0.5, 0.5)
        running_var = jax.random.uniform(k_v, (hidden_channels,), jnp.float32,
                                         0.5, 1.5)
        scale = gamma / jnp.sqrt(running_var + eps)
        shift = beta - running_mean * scale
        params["hidden"].append((
            w,
            b.reshape(1, -1),
            scale.reshape(1, -1),
            shift.reshape(1, -1),
        ))

    # Final Linear((num_layers-1)*hidden, out)
    key, k_w, k_b = jax.random.split(key, 3)
    fan_in = (num_layers - 1) * hidden_channels
    bound = 1.0 / jnp.sqrt(fan_in)
    final_w = jax.random.uniform(k_w, (fan_in, out_channels), jnp.float32,
                                 -bound, bound)
    final_b = jax.random.uniform(k_b, (out_channels,), jnp.float32, -bound, bound)
    params["final_w"] = final_w
    params["final_w_chunks"] = [
        final_w[i * hidden_channels:(i + 1) * hidden_channels, :]
        for i in range(num_layers - 1)
    ]
    params["final_b"] = final_b.reshape(1, -1)
    return params


# ----------------------------------------------------------------------------
# Pure-JAX reference mirroring the PyTorch eval forward (concat form)
# ----------------------------------------------------------------------------
def mlp_forward_ref(x, params):
    xs = []
    h = x
    for (w, b, scale, shift) in params["hidden"]:
        h = jnp.maximum(h @ w + b, 0.0) * scale + shift
        xs.append(h)
    cat = jnp.concatenate(xs, axis=1)
    return cat @ params["final_w"] + params["final_b"]


# ----------------------------------------------------------------------------
if __name__ == "__main__":
    # Lane-dense (128-multiple) feature dims, a few batch tiles so the batch
    # grid has >=2 steps (megacore on v7x), still tiny overall.
    N, IN_C, HID_C, OUT_C, NUM_LAYERS = 512, 128, 128, 128, 3

    key = jax.random.PRNGKey(0)
    key, kx = jax.random.split(key)
    x = jax.random.normal(kx, (N, IN_C), jnp.float32)

    params = init_mlp_params(key, IN_C, HID_C, OUT_C, NUM_LAYERS)

    fwd = jax.jit(functools.partial(mlp_forward, bm=128, use_bf16=False))
    out = jax.block_until_ready(fwd(x, params))

    ref = mlp_forward_ref(x, params)
    assert out.shape == (N, OUT_C)
    assert jnp.allclose(out, ref, atol=1e-4, rtol=1e-4), "mismatch vs reference"

    print("KERNEL_OK")
</pallas_src>

<mosaic_0001>
module attributes {stable_mosaic.version = 11 : i64} {
  func.func @kernel(%arg0: i32, %arg1: memref<128x128xf32, #tpu.memory_space<vmem>>, %arg2: memref<128x128xf32, #tpu.memory_space<vmem>>, %arg3: memref<1x128xf32, #tpu.memory_space<vmem>>, %arg4: memref<1x128xf32, #tpu.memory_space<vmem>>, %arg5: memref<1x128xf32, #tpu.memory_space<vmem>>, %arg6: memref<128x128xf32, #tpu.memory_space<vmem>>, %arg7: memref<128x128xf32, #tpu.memory_space<vmem>>, %arg8: memref<1x128xf32, #tpu.memory_space<vmem>>, %arg9: memref<1x128xf32, #tpu.memory_space<vmem>>, %arg10: memref<1x128xf32, #tpu.memory_space<vmem>>, %arg11: memref<128x128xf32, #tpu.memory_space<vmem>>, %arg12: memref<1x128xf32, #tpu.memory_space<vmem>>, %arg13: memref<128x128xf32, #tpu.memory_space<vmem>>) attributes {dimension_semantics = [#tpu.dimension_semantics<parallel>], iteration_bounds = array<i64: 4>, scalar_prefetch = 0 : i64, scratch_operands = 0 : i64, tpu.core_type = #tpu.core_type<tc>, window_params = [{transform_indices = @transform_0, window_bounds = array<i64: 128, 128>}, {pipeline_mode = #tpu.pipeline_mode<synchronous>, transform_indices = @transform_1, window_bounds = array<i64: 128, 128>}, {pipeline_mode = #tpu.pipeline_mode<synchronous>, transform_indices = @transform_2, window_bounds = array<i64: 1, 128>}, {pipeline_mode = #tpu.pipeline_mode<synchronous>, transform_indices = @transform_3, window_bounds = array<i64: 1, 128>}, {pipeline_mode = #tpu.pipeline_mode<synchronous>, transform_indices = @transform_4, window_bounds = array<i64: 1, 128>}, {pipeline_mode = #tpu.pipeline_mode<synchronous>, transform_indices = @transform_5, window_bounds = array<i64: 128, 128>}, {pipeline_mode = #tpu.pipeline_mode<synchronous>, transform_indices = @transform_6, window_bounds = array<i64: 128, 128>}, {pipeline_mode = #tpu.pipeline_mode<synchronous>, transform_indices = @transform_7, window_bounds = array<i64: 1, 128>}, {pipeline_mode = #tpu.pipeline_mode<synchronous>, transform_indices = @transform_8, window_bounds = array<i64: 1, 128>}, {pipeline_mode = #tpu.pipeline_mode<synchronous>, transform_indices = @transform_9, window_bounds = array<i64: 1, 128>}, {pipeline_mode = #tpu.pipeline_mode<synchronous>, transform_indices = @transform_10, window_bounds = array<i64: 128, 128>}, {pipeline_mode = #tpu.pipeline_mode<synchronous>, transform_indices = @transform_11, window_bounds = array<i64: 1, 128>}, {transform_indices = @transform_12, window_bounds = array<i64: 128, 128>}]} {
    %c0 = arith.constant 0 : index
    %c0_0 = arith.constant 0 : index
    %0 = vector.load %arg1[%c0, %c0_0] : memref<128x128xf32, #tpu.memory_space<vmem>>, vector<128x128xf32>
    %c0_1 = arith.constant 0 : index
    %c0_2 = arith.constant 0 : index
    %1 = vector.load %arg2[%c0_1, %c0_2] : memref<128x128xf32, #tpu.memory_space<vmem>>, vector<128x128xf32>
    %cst = arith.constant dense<0.000000e+00> : vector<128x128xf32>
    %2 = tpu.matmul %0, %1, %cst {dimension_numbers = #tpu.dot_dimension_numbers<[1], [0], [0], [1], [0, 0, 1, 1], [], []>} : vector<128x128xf32>, vector<128x128xf32>, vector<128x128xf32> -> vector<128x128xf32>
    %c0_3 = arith.constant 0 : index
    %c0_4 = arith.constant 0 : index
    %3 = vector.load %arg3[%c0_3, %c0_4] : memref<1x128xf32, #tpu.memory_space<vmem>>, vector<1x128xf32>
    %4 = vector.broadcast %3 : vector<1x128xf32> to vector<128x128xf32>
    %5 = arith.addf %2, %4 : vector<128x128xf32>
    %cst_5 = arith.constant 0.000000e+00 : f32
    %6 = vector.broadcast %cst_5 : f32 to vector<128x128xf32>
    %7 = arith.maximumf %5, %6 : vector<128x128xf32>
    %c0_6 = arith.constant 0 : index
    %c0_7 = arith.constant 0 : index
    %8 = vector.load %arg4[%c0_6, %c0_7] : memref<1x128xf32, #tpu.memory_space<vmem>>, vector<1x128xf32>
    %9 = vector.broadcast %8 : vector<1x128xf32> to vector<128x128xf32>
    %10 = arith.mulf %7, %9 : vector<128x128xf32>
    %c0_8 = arith.constant 0 : index
    %c0_9 = arith.constant 0 : index
    %11 = vector.load %arg5[%c0_8, %c0_9] : memref<1x128xf32, #tpu.memory_space<vmem>>, vector<1x128xf32>
    %12 = vector.broadcast %11 : vector<1x128xf32> to vector<128x128xf32>
    %13 = arith.addf %10, %12 : vector<128x128xf32>
    %c0_10 = arith.constant 0 : index
    %c0_11 = arith.constant 0 : index
    %14 = vector.load %arg6[%c0_10, %c0_11] : memref<128x128xf32, #tpu.memory_space<vmem>>, vector<128x128xf32>
    %cst_12 = arith.constant dense<0.000000e+00> : vector<128x128xf32>
    %15 = tpu.matmul %13, %14, %cst_12 {dimension_numbers = #tpu.dot_dimension_numbers<[1], [0], [0], [1], [0, 0, 1, 1], [], []>} : vector<128x128xf32>, vector<128x128xf32>, vector<128x128xf32> -> vector<128x128xf32>
    %c0_13 = arith.constant 0 : index
    %c0_14 = arith.constant 0 : index
    %16 = vector.load %arg7[%c0_13, %c0_14] : memref<128x128xf32, #tpu.memory_space<vmem>>, vector<128x128xf32>
    %cst_15 = arith.constant dense<0.000000e+00> : vector<128x128xf32>
    %17 = tpu.matmul %13, %16, %cst_15 {dimension_numbers = #tpu.dot_dimension_numbers<[1], [0], [0], [1], [0, 0, 1, 1], [], []>} : vector<128x128xf32>, vector<128x128xf32>, vector<128x128xf32> -> vector<128x128xf32>
    %c0_16 = arith.constant 0 : index
    %c0_17 = arith.constant 0 : index
    %18 = vector.load %arg8[%c0_16, %c0_17] : memref<1x128xf32, #tpu.memory_space<vmem>>, vector<1x128xf32>
    %19 = vector.broadcast %18 : vector<1x128xf32> to vector<128x128xf32>
    %20 = arith.addf %17, %19 : vector<128x128xf32>
    %cst_18 = arith.constant 0.000000e+00 : f32
    %21 = vector.broadcast %cst_18 : f32 to vector<128x128xf32>
    %22 = arith.maximumf %20, %21 : vector<128x128xf32>
    %c0_19 = arith.constant 0 : index
    %c0_20 = arith.constant 0 : index
    %23 = vector.load %arg9[%c0_19, %c0_20] : memref<1x128xf32, #tpu.memory_space<vmem>>, vector<1x128xf32>
    %24 = vector.broadcast %23 : vector<1x128xf32> to vector<128x128xf32>
    %25 = arith.mulf %22, %24 : vector<128x128xf32>
    %c0_21 = arith.constant 0 : index
    %c0_22 = arith.constant 0 : index
    %26 = vector.load %arg10[%c0_21, %c0_22] : memref<1x128xf32, #tpu.memory_space<vmem>>, vector<1x128xf32>
    %27 = vector.broadcast %26 : vector<1x128xf32> to vector<128x128xf32>
    %28 = arith.addf %25, %27 : vector<128x128xf32>
    %c0_23 = arith.constant 0 : index
    %c0_24 = arith.constant 0 : index
    %29 = vector.load %arg11[%c0_23, %c0_24] : memref<128x128xf32, #tpu.memory_space<vmem>>, vector<128x128xf32>
    %cst_25 = arith.constant dense<0.000000e+00> : vector<128x128xf32>
    %30 = tpu.matmul %28, %29, %cst_25 {dimension_numbers = #tpu.dot_dimension_numbers<[1], [0], [0], [1], [0, 0, 1, 1], [], []>} : vector<128x128xf32>, vector<128x128xf32>, vector<128x128xf32> -> vector<128x128xf32>
    %31 = arith.addf %15, %30 : vector<128x128xf32>
    %c0_26 = arith.constant 0 : index
    %c0_27 = arith.constant 0 : index
    %32 = vector.load %arg12[%c0_26, %c0_27] : memref<1x128xf32, #tpu.memory_space<vmem>>, vector<1x128xf32>
    %33 = vector.broadcast %32 : vector<1x128xf32> to vector<128x128xf32>
    %34 = arith.addf %31, %33 : vector<128x128xf32>
    %c0_28 = arith.constant 0 : index
    %c0_29 = arith.constant 0 : index
    %35 = vector.load %arg13[%c0_28, %c0_29] : memref<128x128xf32, #tpu.memory_space<vmem>>, vector<128x128xf32>
    tpu.vector_store %arg13[%c0_28, %c0_29], %34 {strides = array<i32>} : memref<128x128xf32, #tpu.memory_space<vmem>>, vector<128x128xf32>,
    return
  }
  func.func @transform_0(%arg0: i32) -> (i32, i32) {
    %c0_i32 = arith.constant 0 : i32
    %c0_i32_0 = arith.constant 0 : i32
    return %arg0, %c0_i32 : i32, i32
  }
  func.func @transform_1(%arg0: i32) -> (i32, i32) {
    %c0_i32 = arith.constant 0 : i32
    %c0_i32_0 = arith.constant 0 : i32
    %c0_i32_1 = arith.constant 0 : i32
    return %c0_i32, %c0_i32_0 : i32, i32
  }
  func.func @transform_2(%arg0: i32) -> (i32, i32) {
    %c0_i32 = arith.constant 0 : i32
    %c0_i32_0 = arith.constant 0 : i32
    %c0_i32_1 = arith.constant 0 : i32
    return %c0_i32, %c0_i32_0 : i32, i32
  }
  func.func @transform_3(%arg0: i32) -> (i32, i32) {
    %c0_i32 = arith.constant 0 : i32
    %c0_i32_0 = arith.constant 0 : i32
    %c0_i32_1 = arith.constant 0 : i32
    return %c0_i32, %c0_i32_0 : i32, i32
  }
  func.func @transform_4(%arg0: i32) -> (i32, i32) {
    %c0_i32 = arith.constant 0 : i32
    %c0_i32_0 = arith.constant 0 : i32
    %c0_i32_1 = arith.constant 0 : i32
    return %c0_i32, %c0_i32_0 : i32, i32
  }
  func.func @transform_5(%arg0: i32) -> (i32, i32) {
    %c0_i32 = arith.constant 0 : i32
    %c0_i32_0 = arith.constant 0 : i32
    %c0_i32_1 = arith.constant 0 : i32
    return %c0_i32, %c0_i32_0 : i32, i32
  }
  func.func @transform_6(%arg0: i32) -> (i32, i32) {
    %c0_i32 = arith.constant 0 : i32
    %c0_i32_0 = arith.constant 0 : i32
    %c0_i32_1 = arith.constant 0 : i32
    return %c0_i32, %c0_i32_0 : i32, i32
  }
  func.func @transform_7(%arg0: i32) -> (i32, i32) {
    %c0_i32 = arith.constant 0 : i32
    %c0_i32_0 = arith.constant 0 : i32
    %c0_i32_1 = arith.constant 0 : i32
    return %c0_i32, %c0_i32_0 : i32, i32
  }
  func.func @transform_8(%arg0: i32) -> (i32, i32) {
    %c0_i32 = arith.constant 0 : i32
    %c0_i32_0 = arith.constant 0 : i32
    %c0_i32_1 = arith.constant 0 : i32
    return %c0_i32, %c0_i32_0 : i32, i32
  }
  func.func @transform_9(%arg0: i32) -> (i32, i32) {
    %c0_i32 = arith.constant 0 : i32
    %c0_i32_0 = arith.constant 0 : i32
    %c0_i32_1 = arith.constant 0 : i32
    return %c0_i32, %c0_i32_0 : i32, i32
  }
  func.func @transform_10(%arg0: i32) -> (i32, i32) {
    %c0_i32 = arith.constant 0 : i32
    %c0_i32_0 = arith.constant 0 : i32
    %c0_i32_1 = arith.constant 0 : i32
    return %c0_i32, %c0_i32_0 : i32, i32
  }
  func.func @transform_11(%arg0: i32) -> (i32, i32) {
    %c0_i32 = arith.constant 0 : i32
    %c0_i32_0 = arith.constant 0 : i32
    %c0_i32_1 = arith.constant 0 : i32
    return %c0_i32, %c0_i32_0 : i32, i32
  }
  func.func @transform_12(%arg0: i32) -> (i32, i32) {
    %c0_i32 = arith.constant 0 : i32
    %c0_i32_0 = arith.constant 0 : i32
    return %arg0, %c0_i32 : i32, i32
  }
}

</mosaic_0001>

<bundles_post_ra>
// kernel: mlp_forward.1
= control target key start
LH: loop header
LB: loop body
LE: loop exit
PB: predicated region body
PF: predicated region fallthrough
CT: control target
= control target key end

     0   :  { %s2978_s0 = inlined_call_operand.hbm [shape: f32[512,128], index: 0, kind: input, shape index: {}]   ;;  %s2979_s1 = inlined_call_operand.hbm [shape: f32[128,128], index: 1, kind: input, shape index: {}]   ;;  %s2980_s2 = inlined_call_operand.vmem [shape: f32[1,128], index: 2, kind: input, shape index: {}]   ;;  %s2981_s3 = inlined_call_operand.vmem [shape: f32[1,128], index: 3, kind: input, shape index: {}]   ;;  %s2982_s4 = inlined_call_operand.vmem [shape: f32[1,128], index: 4, kind: input, shape index: {}]   ;;  %s2983_s5 = inlined_call_operand.hbm [shape: f32[128,128], index: 5, kind: input, shape index: {}]   ;;  %s2984_s6 = inlined_call_operand.hbm [shape: f32[128,128], index: 6, kind: input, shape index: {}]   ;;  %s2985_s7 = inlined_call_operand.vmem [shape: f32[1,128], index: 7, kind: input, shape index: {}]   ;;  %s2986_s8 = inlined_call_operand.vmem [shape: f32[1,128], index: 8, kind: input, shape index: {}]   ;;  %s2987_s9 = inlined_call_operand.vmem [shape: f32[1,128], index: 9, kind: input, shape index: {}]   ;;  %s2988_s10 = inlined_call_operand.hbm [shape: f32[128,128], index: 10, kind: input, shape index: {}]   ;;  %s2989_s11 = inlined_call_operand.hbm [shape: f32[1,128], index: 11, kind: input, shape index: {}]   ;;  %s2990_s12 = inlined_call_operand.hbm [shape: f32[512,128], index: 12, kind: output, shape index: {}]  }
   0x1   :  { %2996 = sst [smem:[#allocation19_spill]] %s2979_s1 }
   0x2   :  { %2997 = sst [smem:[#allocation20_spill]] %s2985_s7 }
   0x3   :  { %2998 = sst [smem:[#allocation21_spill]] %s2986_s8 }
   0x4   :  { %2999 = sst [smem:[#allocation22_spill]] %s2987_s9 }
   0x5   :  { %3000 = sst [smem:[#allocation23_spill]] %s2990_s12 }
   0x6   :  { %17 = vsyncpa [#allocation3], 0 }
   0x7   :  { %19 = vsyncpa [#allocation3 + $0x1], 0 }
   0x8   :  { %20 = vsyncpa [#allocation6], 0 }
   0x9   :  { %21 = vsyncpa [#allocation9], 0 }
   0xa   :  { %22 = vsyncpa [#allocation12], 0 }
   0xb   :  { %23 = vsyncpa [#allocation4], 0 }
   0xc   :  { %25 = vsyncpa [#allocation4 + $0x1], 0  ;;  %s2433_s21 = smov 0   ;;  %s2435_s22 = smov 0  }
   0xd   :  { %s2437_s23 = smov 0   ;;  %s2439_s24 = smov 0  }
   0xe LB: > { %s2357_s25 = smov [#allocation5]   ;;  %s2454_s27 = sadd.s32 4294967295, %s2355_s24   ;;  %s2355_s24 = sphi %s2439_s24, %s3027_s24   ;;  %s2351_s23 = sphi %s2437_s23, %s3026_s23   ;;  %s2347_s22 = sphi %s2435_s22, %s3025_s22   ;;  %s2343_s21 = sphi %s2433_s21, %s3024_s21  }
   0xf   : > { %s331_s26 = sshll.u32 %s2357_s25, 4  ;;  %p1478_p0 = scmp.ge.s32.totalorder %s2355_s24, 1  ;;  %s2459_s26 = int_to_ptr.vmem [resolvable:$true] %s331_s26 }
  0x10   : > { %p2992_p1 = scmp.eq.s32.totalorder %s2454_s27, 0  ;;  %p319_p2 = scmp.lt.s32.totalorder %s2355_s24, 5 }
  0x11   : > { %s2358_s29 = smov [#allocation8]   ;;  %s2359_s14 = smov [#allocation7]  }
  0x12   : > { %p2461_p3 = pnand %p1478_p0, %p319_p2  ;;  %s366_s30 = sshll.u32 %s2358_s29, 4  ;;  %s2473_s30 = int_to_ptr.vmem [resolvable:$true] %s366_s30 }
  0x13   : > { %s353_s15 = sshll.u32 %s2359_s14, 4  ;;  %s3003_s1 = sld [smem:[#allocation19_spill]]  ;;  %s2475_s15 = int_to_ptr.vmem [resolvable:$true] %s353_s15 }
  0x14   : > { %s3001_s28 = scalar_select %p2461_p3, 1, 0 }
  0x15   : > { %p2030_p4 = pneg %p2461_p3 }
  0x17   : > { %p2469_p5 = pnand %p2030_p4, %p2992_p1 }
  0x19   : > { %s2107_s18 = scalar_lea.hbm %s3003_s1, 2048  ;;  %p2485_p7 = pneg %p2469_p5 }
  0x1a   : > { %p2108_p6 = scmp.ne.s32.totalorder %s3003_s1, %s2107_s18  ;;  %p2114_p10 = scmp.lt.u32.totalorder %s2107_s18, %s3003_s1 }
  0x1c   : > { %p2110_p8 = pnand %p2485_p7, %p2108_p6 }
  0x1e   : > { %p2111_p9 = pneg %p2110_p8 }
  0x20   : > { %p2116_p11 = pnand %p2114_p10, %p2111_p9 }
  0x22   : > { %2119 = shalt.err (!%p2116_p11)
}
  0x23   : > { %s2120_s16 = scalar_lea.vmem %s2459_s26, 2048  ;;  %p2128_p2 = scmp.lt.s32.totalorder %s2459_s26, %s2459_s26 }
  0x24   : > { %p2121_p12 = scmp.ne.s32.totalorder %s2459_s26, %s2120_s16  ;;  %p2129_p4 = scmp.lt.s32.totalorder %s2120_s16, %s2120_s16 }
  0x26   : > { %p2123_p13 = pnand %p2121_p12, %p2485_p7  ;;  %p2130_p6 = por %p2129_p4, %p2128_p2 }
  0x28   : > { %p2124_p0 = pneg %p2123_p13 }
  0x2a   : > { %p2131_p8 = pnand %p2130_p6, %p2124_p0 }
  0x2c   : > { %2134 = shalt.err (!%p2131_p8)
}
  0x2d   : > { %s2994_s17 = smov 128   ;;  %s2361_s18 = smov 8  }
  0x2e   : > { %2033 = dma.hbm_to_vmem [thread:$0]  (!%p2469_p5), %s3003_s1, 2048, %s2459_s26, [#allocation6], %s2994_s17, %s2994_s17, %s2361_s18  }
  0x2f   : > { %s2135_s16 = scalar_lea.hbm %s2984_s6, 2048 }
  0x30   : > { %p2136_p9 = scmp.ne.s32.totalorder %s2984_s6, %s2135_s16  ;;  %p2142_p12 = scmp.lt.u32.totalorder %s2135_s16, %s2984_s6 }
  0x32   : > { %p2138_p10 = pnand %p2136_p9, %p2485_p7 }
  0x34   : > { %p2139_p11 = pneg %p2138_p10 }
  0x36   : > { %p2144_p13 = pnand %p2142_p12, %p2139_p11 }
  0x38   : > { %2147 = shalt.err (!%p2144_p13)
}
  0x39   : > { %s2148_s26 = scalar_lea.vmem %s2473_s30, 2048  ;;  %p2156_p6 = scmp.lt.s32.totalorder %s2473_s30, %s2473_s30 }
  0x3a   : > { %p2149_p0 = scmp.ne.s32.totalorder %s2473_s30, %s2148_s26  ;;  %p2157_p8 = scmp.lt.s32.totalorder %s2148_s26, %s2148_s26 }
  0x3c   : > { %p2151_p2 = pnand %p2149_p0, %p2485_p7  ;;  %p2158_p9 = por %p2157_p8, %p2156_p6 }
  0x3e   : > { %p2152_p4 = pneg %p2151_p2 }
  0x40   : > { %p2159_p10 = pnand %p2158_p9, %p2152_p4 }
  0x42   : > { %2162 = shalt.err (!%p2159_p10)
}
  0x43   : > { %2039 = dma.hbm_to_vmem [thread:$0]  (!%p2469_p5), %s2984_s6, 2048, %s2473_s30, [#allocation9], %s2994_s17, %s2994_s17, %s2361_s18  }
  0x44   : > { %s2163_s19 = scalar_lea.hbm %s2983_s5, 2048 }
  0x45   : > { %p2164_p11 = scmp.ne.s32.totalorder %s2983_s5, %s2163_s19  ;;  %p2170_p0 = scmp.lt.u32.totalorder %s2163_s19, %s2983_s5 }
  0x47   : > { %p2166_p12 = pnand %p2164_p11, %p2485_p7 }
  0x49   : > { %p2167_p13 = pneg %p2166_p12 }
  0x4b   : > { %p2172_p2 = pnand %p2170_p0, %p2167_p13 }
  0x4d   : > { %2175 = shalt.err (!%p2172_p2)
}
  0x4e   : > { %s2176_s30 = scalar_lea.vmem %s2475_s15, 2048  ;;  %p2184_p9 = scmp.lt.s32.totalorder %s2475_s15, %s2475_s15 }
  0x4f   : > { %p2177_p4 = scmp.ne.s32.totalorder %s2475_s15, %s2176_s30  ;;  %p2185_p10 = scmp.lt.s32.totalorder %s2176_s30, %s2176_s30 }
  0x51   : > { %p2179_p6 = pnand %p2177_p4, %p2485_p7  ;;  %p2186_p11 = por %p2185_p10, %p2184_p9 }
  0x53   : > { %p2180_p8 = pneg %p2179_p6 }
  0x55   : > { %p2187_p12 = pnand %p2186_p11, %p2180_p8 }
  0x57   : > { %2190 = shalt.err (!%p2187_p12)
}
  0x58   : > { %2036 = dma.hbm_to_vmem [thread:$0]  (!%p2469_p5), %s2983_s5, 2048, %s2475_s15, [#allocation6], %s2994_s17, %s2994_s17, %s2361_s18  }
  0x59   : > { %s2362_s8 = smov [#allocation10]   ;;  %s2363_s12 = smov [#allocation11]  }
  0x5a   : > { %s388_s9 = sshll.u32 %s2362_s8, 4  ;;  %s402_s19 = sshll.u32 %s2363_s12, 4  ;;  %s389_s9 = int_to_ptr.vmem [resolvable:$true] %s388_s9  ;;  %s403_s19 = int_to_ptr.vmem [resolvable:$true] %s402_s19 }
  0x5b   : > { %s2191_s14 = scalar_lea.hbm %s2988_s10, 2048 }
  0x5c   : > { %p2192_p13 = scmp.ne.s32.totalorder %s2988_s10, %s2191_s14  ;;  %p2198_p4 = scmp.lt.u32.totalorder %s2191_s14, %s2988_s10 }
  0x5e   : > { %p2194_p0 = pnand %p2192_p13, %p2485_p7 }
  0x60   : > { %p2195_p2 = pneg %p2194_p0 }
  0x62   : > { %p2200_p6 = pnand %p2198_p4, %p2195_p2 }
  0x64   : > { %2203 = shalt.err (!%p2200_p6)
}
  0x65   : > { %s2204_s15 = scalar_lea.vmem %s389_s9, 2048  ;;  %p2212_p11 = scmp.lt.s32.totalorder %s389_s9, %s389_s9 }
  0x66   : > { %p2205_p8 = scmp.ne.s32.totalorder %s389_s9, %s2204_s15  ;;  %p2213_p12 = scmp.lt.s32.totalorder %s2204_s15, %s2204_s15 }
  0x68   : > { %p2207_p9 = pnand %p2205_p8, %p2485_p7  ;;  %p2214_p1 = por %p2213_p12, %p2212_p11 }
  0x6a   : > { %p2208_p10 = pneg %p2207_p9 }
  0x6c   : > { %p2215_p3 = pnand %p2214_p1, %p2208_p10 }
  0x6e   : > { %2218 = shalt.err (!%p2215_p3)
}
  0x6f   : > { %2042 = dma.hbm_to_vmem [thread:$0]  (!%p2469_p5), %s2988_s10, 2048, %s389_s9, [#allocation9], %s2994_s17, %s2994_s17, %s2361_s18  }
  0x70   : > { %s2219_s20 = scalar_lea.hbm %s2989_s11, 16 }
  0x71   : > { %p2220_p1 = scmp.ne.s32.totalorder %s2989_s11, %s2219_s20  ;;  %p2226_p0 = scmp.lt.u32.totalorder %s2219_s20, %s2989_s11 }
  0x73   : > { %p2222_p3 = pnand %p2220_p1, %p2485_p7 }
  0x75   : > { %p2223_p13 = pneg %p2222_p3 }
  0x77   : > { %p2228_p2 = pnand %p2226_p0, %p2223_p13 }
  0x79   : > { %2231 = shalt.err (!%p2228_p2)
}
  0x7a   : > { %s2232_s26 = scalar_lea.vmem %s403_s19, 16  ;;  %s2239_s9 = scalar_lea.vmem %s403_s19, 32 }
  0x7b   : > { %p2233_p4 = scmp.ne.s32.totalorder %s403_s19, %s2232_s26  ;;  %p2240_p9 = scmp.lt.s32.totalorder %s403_s19, %s403_s19 }
  0x7c   : > { %p2241_p10 = scmp.lt.s32.totalorder %s2239_s9, %s2232_s26 }
  0x7d   : > { %p2235_p6 = pnand %p2233_p4, %p2485_p7 }
  0x7e   : > { %p2242_p11 = por %p2241_p10, %p2240_p9 }
  0x7f   : > { %p2236_p8 = pneg %p2235_p6 }
  0x81   : > { %p2243_p12 = pnand %p2242_p11, %p2236_p8 }
  0x83   : > { %2246 = shalt.err (!%p2243_p12)
}
  0x84   : > { %2045 = dma.hbm_to_vmem [thread:$0]  (!%p2469_p5), %s2989_s11, 16, %s403_s19, [#allocation12]  }
  0x85   : > { %s1477_s25 = sadd.s32 4294967294, %s2355_s24   ;;  %s2602_s13 = sadd.s32 1, %s2355_s24  }
  0x86   : > { %s38_s7 = sadd.s32 1, %s2351_s23  ;;  %s35_s8 = ssub.s32 %s2355_s24, %s2602_s13 }
  0x87   : > { %p45_p7 = scmp.ne.s32.totalorder %s2351_s23, %s2347_s22  ;;  %p36_p1 = scmp.eq.s32.totalorder %s35_s8, 0 }
  0x88   : > { %p46_p3 = scmp.eq.s32.totalorder %s2355_s24, 0  ;;  %p51_p13 = scmp.ne.s32.totalorder %s2347_s22, %s2343_s21 }
  0x89   : > { %p306_p0 = scmp.eq.s32.totalorder %s2454_s27, 3  ;;  %p3005_p4 = scmp.eq.s32.totalorder %s2454_s27, 0 }
  0x8a   : > { %s2614_s12 = scalar_select %p36_p1, %s2351_s23, %s38_s7  }
  0x8b   : > { %p47_p2 = por %p46_p3, %p45_p7  ;;  %p2618_p6 = por %p3005_p4, %p51_p13 }
  0x8c   : > { %p2622_p5 = por %p306_p0, %p45_p7  ;;  %p312_p8 = scmp.eq.s32.totalorder %s1477_s25, 3 }
  0x8d   : > { %p2059_p9 = scmp.lt.s32.totalorder %s2355_s24, 4  ;;  %s413_s29 = sand.u32 1, %s2351_s23  }
  0x8e   : > { %s3007_s19 = scalar_select %p2622_p5, 1, 0 }
  0x8f   : > { %p2628_p10 = por %p312_p8, %p51_p13  ;;  %s1485_s16 = sshll.u32 %s413_s29, 7 }
  0x90   : > { %s1508_s30 = sshll.u32 %s2355_s24, 11  ;;  %s417_s1 = scalar_lea.vmem [#allocation2], %s1485_s16 }
  0x91   : > { %s3008_s14 = scalar_select %p2628_p10, 1, 0 }
  0x92   : > { %s2636_s15 = scalar_lea.hbm %s2978_s0, %s1508_s30  ;;  %s424_s7 = sshll.u32 %s417_s1, 4  ;;  %s2642_s7 = int_to_ptr.vmem [resolvable:$true] %s424_s7 }
  0x93   : > { %p2638_p11 = pnand %p2059_p9, %p47_p2  ;;  %s2644_s8 = scalar_lea.sflag [#allocation3], %s413_s29 }
  0x94   : > { %s2247_s17 = scalar_lea.hbm %s2636_s15, 2048  ;;  %s2252_s26 = scalar_lea.hbm %s2978_s0, 8192 }
  0x95   : > { %p2248_p12 = scmp.ne.s32.totalorder %s2636_s15, %s2247_s17  ;;  %p2249_p7 = pneg %p2638_p11 }
  0x96   : > { %p2253_p13 = scmp.lt.u32.totalorder %s2636_s15, %s2978_s0  ;;  %p2254_p0 = scmp.lt.u32.totalorder %s2252_s26, %s2247_s17 }
  0x97   : > { %p2250_p1 = pnand %p2249_p7, %p2248_p12  ;;  %p2256_p4 = scmp.lt.u32.totalorder %s2247_s17, %s2636_s15 }
  0x98   : > { %p2255_p2 = por %p2254_p0, %p2253_p13 }
  0x99   : > { %p2251_p3 = pneg %p2250_p1 }
  0x9a   : > { %p2257_p8 = por %p2256_p4, %p2255_p2 }
  0x9c   : > { %p2258_p9 = pnand %p2257_p8, %p2251_p3 }
  0x9e   : > { %2261 = shalt.err (!%p2258_p9)
}
  0x9f   : > { %s2262_s29 = scalar_lea.vmem %s2642_s7, 2048  ;;  %s2364_s16 = smov [#allocation2]  }
  0xa0   : > { %p2263_p12 = scmp.ne.s32.totalorder %s2642_s7, %s2262_s29  ;;  %s2267_s30 = sshll.u32 %s2364_s16, 4  ;;  %s2268_s30 = int_to_ptr.vmem [resolvable:$false] %s2267_s30 }
  0xa1   : > { %s2269_s9 = scalar_lea.vmem %s2268_s30, 4096  ;;  %p2270_p5 = scmp.lt.s32.totalorder %s2642_s7, %s2268_s30 }
  0xa2   : > { %p2265_p1 = pnand %p2263_p12, %p2249_p7  ;;  %p2271_p13 = scmp.lt.s32.totalorder %s2269_s9, %s2262_s29 }
  0xa4   : > { %p2266_p10 = pneg %p2265_p1  ;;  %p2272_p0 = por %p2271_p13, %p2270_p5 }
  0xa6   : > { %p2273_p2 = pnand %p2272_p0, %p2266_p10 }
  0xa8   : > { %2276 = shalt.err (!%p2273_p2)
}
  0xa9   : > { %s3010_s17 = smov 128   ;;  %p3011_p7 = scmp.ne.s32.totalorder %s3001_s28, 0 }
  0xaa   : > { %2049 = dma.hbm_to_vmem [thread:$0]  (!%p2638_p11), %s2636_s15, 2048, %s2642_s7, %s2644_s8, %s3010_s17, %s3010_s17, %s2361_s18  }
  0xab   : > { %436 = sbr.rel (%p3011_p7) target bundleno = 958 (0x3be), region = 68  ;;  %s2678_s26 = sand.u32 (!%p3011_p7), 1, %s2347_s22  }
  0xac   : > { %s1489_s1 = sshll.u32 (!%p3011_p7), %s2678_s26, 7  ;;  %s439_s29 = scalar_lea.sflag (!%p3011_p7), [#allocation3], %s2678_s26 }
  0xad   : > { %s2684_s25 = scalar_lea.vmem (!%p3011_p7), [#allocation2], %s1489_s1 }
  0xb2   : > { %2322 = dma.done.wait (%p2618_p6), %s439_s29, 2048  }
  0xb3   : > { %2324 = vsyncadd (%p2618_p6), %s439_s29, 4294965248  ;;  %p3012_p5 = scmp.eq.s32.totalorder %s2454_s27, 0 }
  0xb5   : > { %2326 = dma.done.wait (%p3012_p5), [#allocation6], 4096   ;;  %p3013_p10 = pmov %p3012_p5 }
  0xb6   : > { %p3014_p11 = pmov %p3012_p5 }
  0xb7   : > { %2328 = vsyncadd (%p3013_p10), [#allocation6], 4294963200 }
  0xb8   : > { %2330 = dma.done.wait (%p3014_p11), [#allocation9], 4096   ;;  %p3015_p3 = pmov %p3012_p5 }
  0xba   : > { %2332 = vsyncadd (%p3015_p3), [#allocation9], 4294963200  ;;  %p3016_p4 = pmov %p3015_p3 }
  0xbb   : > { %p3017_p8 = pmov %p3015_p3 }
  0xbc   : > { %2334 = dma.done.wait (%p3016_p4), [#allocation12], 16  }
  0xbd   : > { %2336 = vsyncadd (%p3017_p8), [#allocation12], 4294967280  ;;  %v521_v0 = vld [vmem:[#allocation5] sm:$0xff]  ;;  %v522_v1 = vld [vmem:[#allocation5 + $0x8] sm:$0xff]  ;;  %s3018_s9 = sld [smem:[#allocation20_spill]]  ;;  %s3020_s20 = sld [smem:[#allocation22_spill]] }
  0xbe   : > { %v523_v2 = vld [vmem:[#allocation5 + $0x10] sm:$0xff]  ;;  %v1862_v3 = vpack.c.bf16 %v522_v1, %v521_v0  ;;  %v524_v4 = vld [vmem:[#allocation5 + $0x18] sm:$0xff]  ;;  %v525_v6 = vld [vmem:[#allocation5 + $0x20] sm:$0xff]  ;;  %s2910_s15 = scalar_lea.vmem [#allocation13], %s1489_s1  ;;  %s1509_s1 = sshll.u32 %s2454_s27, 11 }
  0xbf   : > { %v1866_v5 = vpack.c.bf16 %v524_v4, %v523_v2  ;;  %v526_v7 = vld [vmem:[#allocation5 + $0x28] sm:$0xff]  ;;  %v505_v9 = vld [vmem:[%s2684_s25] sm:$0xff]  ;;  %v527_v10 = vld [vmem:[#allocation5 + $0x30] sm:$0xff]  ;;  %s1356_s7 = sshll.u32 %s2910_s15, 4  ;;  %s3021_s30 = sld [smem:[#allocation23_spill]]  ;;  %s2933_s7 = int_to_ptr.vmem [resolvable:$true] %s1356_s7 }
  0xc0   : > { %1863 = vmatprep.subr.bf16.mxu1 %v1862_v3  ;;  %v1870_v8 = vpack.c.bf16 %v526_v7, %v525_v6  ;;  %v528_v11 = vld [vmem:[#allocation5 + $0x38] sm:$0xff]  ;;  %1670 = vmatprep.mubr.f32.mxu1 %v505_v9  ;;  %v529_v13 = vld [vmem:[#allocation5 + $0x40] sm:$0xff]  ;;  %v530_v14 = vld [vmem:[#allocation5 + $0x48] sm:$0xff]  ;;  %s1343_s27 = scalar_lea.sflag [#allocation4], %s2678_s26  ;;  %s2277_s17 = scalar_lea.vmem %s2933_s7, 2048 }
  0xc1   : > { %1865 = vmatpush3.bf16.msra.mxu1 %v1862_v3  ;;  %v1874_v12 = vpack.c.bf16 %v528_v11, %v527_v10  ;;  %v1878_v15 = vpack.c.bf16 %v530_v14, %v529_v13  ;;  %v531_v16 = vld [vmem:[#allocation5 + $0x50] sm:$0xff]  ;;  %v532_v17 = vld [vmem:[#allocation5 + $0x58] sm:$0xff]  ;;  %v533_v19 = vld [vmem:[#allocation5 + $0x60] sm:$0xff]  ;;  %p2278_p6 = scmp.ne.s32.totalorder %s2933_s7, %s2277_s17  ;;  %p3022_p9 = scmp.ne.s32.totalorder %s3007_s19, 0 }
  0xc2   : > { %1867 = vmatprep.subr.bf16.mxu1 %v1866_v5  ;;  %v1882_v18 = vpack.c.bf16 %v532_v17, %v531_v16  ;;  %v534_v20 = vld [vmem:[#allocation5 + $0x68] sm:$0xff]  ;;  %v535_v22 = vld [vmem:[#allocation5 + $0x70] sm:$0xff]  ;;  %v536_v23 = vld [vmem:[#allocation5 + $0x78] sm:$0xff]  ;;  %s2365_s29 = smov [#allocation13]  }
  0xc3   : > { %v1886_v21 = vpack.c.bf16 %v534_v20, %v533_v19  ;;  %v1890_v24 = vpack.c.bf16 %v536_v23, %v535_v22  ;;  %v767_v25 = vld [vmem:[#allocation8] sm:$0xff]  ;;  %v768_v26 = vld [vmem:[#allocation8 + $0x8] sm:$0xff]  ;;  %v769_v28 = vld [vmem:[#allocation8 + $0x10] sm:$0xff]  ;;  %p2279_p12 = pnand %p2278_p6, %p3022_p9 }
  0xc4   : > { %v1894_v27 = vpack.c.bf16 %v768_v26, %v767_v25  ;;  %v770_v29 = vld [vmem:[#allocation8 + $0x18] sm:$0xff]  ;;  %v506_v30 = vld [vmem:[%s2684_s25 + $0x8] sm:$0xff]  ;;  %v507_v31 = vld [vmem:[%s2684_s25 + $0x10] sm:$0xff] }
  0xc5   : > { %1869 = vmatpush3.bf16.msra.mxu1 %v1866_v5  ;;  %v1898_v32 = vpack.c.bf16 %v770_v29, %v769_v28  ;;  %v771_v33 = vld [vmem:[#allocation8 + $0x20] sm:$0xff]  ;;  %v772_v34 = vld [vmem:[#allocation8 + $0x28] sm:$0xff]  ;;  %v508_v35 = vld [vmem:[%s2684_s25 + $0x18] sm:$0xff]  ;;  %p2280_p1 = pneg %p2279_p12 }
  0xc6   : > { %1871 = vmatprep.subr.bf16.mxu1 %v1870_v8  ;;  %v509_v36 = vld [vmem:[%s2684_s25 + $0x20] sm:$0xff]  ;;  %v1902_v37 = vpack.c.bf16 %v772_v34, %v771_v33  ;;  %v773_v38 = vld [vmem:[#allocation8 + $0x30] sm:$0xff]  ;;  %v774_v39 = vld [vmem:[#allocation8 + $0x38] sm:$0xff] }
  0xc7   : > { %v510_v40 = vld [vmem:[%s2684_s25 + $0x28] sm:$0xff]  ;;  %v511_v41 = vld [vmem:[%s2684_s25 + $0x30] sm:$0xff]  ;;  %v1906_v42 = vpack.c.bf16 %v774_v39, %v773_v38  ;;  %v775_v43 = vld [vmem:[#allocation8 + $0x40] sm:$0xff] }
  0xc8   : > { %v776_v44 = vld [vmem:[#allocation8 + $0x48] sm:$0xff]  ;;  %v512_v45 = vld [vmem:[%s2684_s25 + $0x38] sm:$0xff]  ;;  %v513_v46 = vld [vmem:[%s2684_s25 + $0x40] sm:$0xff] }
  0xc9   : > { %1873 = vmatpush3.bf16.msra.mxu1 %v1870_v8  ;;  %v1910_v47 = vpack.c.bf16 %v776_v44, %v775_v43  ;;  %v777_v48 = vld [vmem:[#allocation8 + $0x50] sm:$0xff]  ;;  %v778_v49 = vld [vmem:[#allocation8 + $0x58] sm:$0xff]  ;;  %v514_v50 = vld [vmem:[%s2684_s25 + $0x48] sm:$0xff] }
  0xca   : > { %1875 = vmatprep.subr.bf16.mxu1 %v1874_v12  ;;  %v515_v51 = vld [vmem:[%s2684_s25 + $0x50] sm:$0xff]  ;;  %v1914_v52 = vpack.c.bf16 %v778_v49, %v777_v48  ;;  %v516_v53 = vld [vmem:[%s2684_s25 + $0x58] sm:$0xff]  ;;  %v517_v54 = vld [vmem:[%s2684_s25 + $0x60] sm:$0xff] }
  0xcb   : > { %v518_v55 = vld [vmem:[%s2684_s25 + $0x68] sm:$0xff]  ;;  %v519_v56 = vld [vmem:[%s2684_s25 + $0x70] sm:$0xff]  ;;  %v520_v57 = vld [vmem:[%s2684_s25 + $0x78] sm:$0xff]  ;;  %s3019_s25 = sld [smem:[#allocation21_spill]] }
  0xcc   : > { %v779_v58 = vld [vmem:[#allocation8 + $0x60] sm:$0xff]  ;;  %v780_v59 = vld [vmem:[#allocation8 + $0x68] sm:$0xff]  ;;  %v781_v61 = vld [vmem:[#allocation8 + $0x70] sm:$0xff] }
  0xcd   : > { %1877 = vmatpush3.bf16.msra.mxu1 %v1874_v12  ;;  %v1918_v60 = vpack.c.bf16 %v780_v59, %v779_v58  ;;  %v782_v62 = vld [vmem:[#allocation8 + $0x78] sm:$0xff]  ;;  %v997_v0 = vld [vmem:[#allocation10] sm:$0xff]  ;;  %v998_v1 = vld [vmem:[#allocation10 + $0x8] sm:$0xff] }
  0xce   : > { %1879 = vmatprep.subr.bf16.mxu1 %v1878_v15  ;;  %v1922_v63 = vpack.c.bf16 %v782_v62, %v781_v61  ;;  %v999_v2 = vld [vmem:[#allocation10 + $0x10] sm:$0xff]  ;;  %v1926_v3 = vpack.c.bf16 %v998_v1, %v997_v0  ;;  %v1000_v4 = vld [vmem:[#allocation10 + $0x18] sm:$0xff]  ;;  %v1001_v6 = vld [vmem:[#allocation10 + $0x20] sm:$0xff] }
  0xcf   : > { %v1930_v5 = vpack.c.bf16 %v1000_v4, %v999_v2  ;;  %v1002_v7 = vld [vmem:[#allocation10 + $0x28] sm:$0xff]  ;;  %v1003_v9 = vld [vmem:[#allocation10 + $0x30] sm:$0xff]  ;;  %v1004_v10 = vld [vmem:[#allocation10 + $0x38] sm:$0xff] }
  0xd0   : > { %1927 = vmatprep.subr.bf16.mxu0 %v1926_v3  ;;  %v1934_v8 = vpack.c.bf16 %v1002_v7, %v1001_v6  ;;  %v1938_v11 = vpack.c.bf16 %v1004_v10, %v1003_v9  ;;  %v1005_v12 = vld [vmem:[#allocation10 + $0x40] sm:$0xff]  ;;  %v1006_v13 = vld [vmem:[#allocation10 + $0x48] sm:$0xff]  ;;  %v1008_v16 = vld [vmem:[#allocation10 + $0x58] sm:$0xff] }
  0xd1   : > { %1881 = vmatpush3.bf16.msra.mxu1 %v1878_v15  ;;  %1929 = vmatpush3.bf16.msra.mxu0 %v1926_v3  ;;  %v1942_v14 = vpack.c.bf16 %v1006_v13, %v1005_v12  ;;  %v1007_v15 = vld [vmem:[#allocation10 + $0x50] sm:$0xff]  ;;  %v2727_v22 = vld [vmem:[%s2981_s3] ss:$0 sm:$0xff] }
  0xd2   : > { %1883 = vmatprep.subr.bf16.mxu1 %v1882_v18  ;;  %1931 = vmatprep.subr.bf16.mxu0 %v1930_v5  ;;  %v1946_v17 = vpack.c.bf16 %v1008_v16, %v1007_v15  ;;  %v2734_v28 = vld [vmem:[%s2982_s4] ss:$0 sm:$0xff] }
  0xd5   : > { %1885 = vmatpush3.bf16.msra.mxu1 %v1882_v18  ;;  %1933 = vmatpush3.bf16.msra.mxu0 %v1930_v5  ;;  %v2721_v18 = vld [vmem:[%s2980_s2] ss:$0 sm:$0xff] }
  0xd6   : > { %1887 = vmatprep.subr.bf16.mxu1 %v1886_v21  ;;  %1935 = vmatprep.subr.bf16.mxu0 %v1934_v8 }
  0xd9   : > { %1889 = vmatpush3.bf16.msra.mxu1 %v1886_v21  ;;  %1937 = vmatpush3.bf16.msra.mxu0 %v1934_v8 }
  0xda   : > { %1891 = vmatprep.subr.bf16.mxu1 %v1890_v24  ;;  %1939 = vmatprep.subr.bf16.mxu0 %v1938_v11 }
  0xdd   : > { %1893 = vmatpush3.bf16.msra.mxu1 %v1890_v24  ;;  %1941 = vmatpush3.bf16.msra.mxu0 %v1938_v11 }
  0xde   : > { %1895 = vmatprep.subr.bf16.mxu1 %v1894_v27  ;;  %1943 = vmatprep.subr.bf16.mxu0 %v1942_v14 }
  0xe0   : > { %1671 = vmatmul.mubr.f32.vlgmr.msra.gmra.mrb[0].mxu1 %v506_v30 }
  0xe1   : > { %1673 = vmatprep.mubr.f32.mxu1 %v507_v31  ;;  %1897 = vmatpush3.bf16.msra.mxu1 %v1894_v27 }
  0xe2   : > { %1899 = vmatprep.subr.bf16.mxu1 %v1898_v32  ;;  %1945 = vmatpush3.bf16.msra.mxu0 %v1942_v14 }
  0xe3   : > { %1947 = vmatprep.subr.bf16.mxu0 %v1946_v17 }
  0xe4   : > { %1674 = vmatmul.mubr.f32.gmra.mrb[2].mxu1 %v508_v35 }
  0xe5   : > { %1676 = vmatprep.mubr.f32.mxu1 %v509_v36  ;;  %1901 = vmatpush3.bf16.msra.mxu1 %v1898_v32 }
  0xe6   : > { %1903 = vmatprep.subr.bf16.mxu1 %v1902_v37  ;;  %1949 = vmatpush3.bf16.msra.mxu0 %v1946_v17 }
  0xe8   : > { %1677 = vmatmul.mubr.f32.gmra.mrb[4].mxu1 %v510_v40 }
  0xe9   : > { %1679 = vmatprep.mubr.f32.mxu1 %v511_v41  ;;  %1905 = vmatpush3.bf16.msra.mxu1 %v1902_v37 }
  0xea   : > { %1907 = vmatprep.subr.bf16.mxu1 %v1906_v42 }
  0xec   : > { %1680 = vmatmul.mubr.f32.gmra.mrb[6].mxu1 %v512_v45 }
  0xed   : > { %1682 = vmatprep.mubr.f32.mxu1 %v513_v46  ;;  %1909 = vmatpush3.bf16.msra.mxu1 %v1906_v42 }
  0xee   : > { %1911 = vmatprep.subr.bf16.mxu1 %v1910_v47 }
  0xf0   : > { %1683 = vmatmul.mubr.f32.gmra.mrb[8].mxu1 %v514_v50 }
  0xf1   : > { %1685 = vmatprep.mubr.f32.mxu1 %v515_v51  ;;  %1913 = vmatpush3.bf16.msra.mxu1 %v1910_v47 }
  0xf2   : > { %1915 = vmatprep.subr.bf16.mxu1 %v1914_v52 }
  0xf4   : > { %1686 = vmatmul.mubr.f32.gmra.mrb[10].mxu1 %v516_v53 }
  0xf5   : > { %1688 = vmatprep.mubr.f32.mxu1 %v517_v54  ;;  %1917 = vmatpush3.bf16.msra.mxu1 %v1914_v52 }
  0xf6   : > { %1919 = vmatprep.subr.bf16.mxu1 %v1918_v60 }
  0xf8   : > { %1689 = vmatmul.mubr.f32.gmra.mrb[12].mxu1 %v518_v55 }
  0xf9   : > { %1691 = vmatprep.mubr.f32.mxu1 %v519_v56  ;;  %1921 = vmatpush3.bf16.msra.mxu1 %v1918_v60 }
  0xfa   : > { %1923 = vmatprep.subr.bf16.mxu1 %v1922_v63 }
  0xfc   : > { %1692 = vmatmul.mubr.f32.gmra.mrb[14].mxu1 %v520_v57 }
  0xfd   : > { %1925 = vmatpush3.bf16.msra.mxu1 %v1922_v63 }
 0x1b3   : > { %v1672_v19 = vpop.f32.mrb[0].mxu1 }
 0x1b4   : > { %v616_v20 = vadd.f32 %v1672_v19, %v2721_v18  ;;  %v610_v21 = vpop.f32.mrb[1].mxu1 }
 0x1b5   : > { %v611_v23 = vadd.f32 %v2721_v18, %v610_v21 }
 0x1b6   : > { %v690_v24 = vmax.f32 %v616_v20, 0.0 }
 0x1b7   : > { %v689_v25 = vmax.f32 %v611_v23, 0.0  ;;  %v1675_v26 = vpop.f32.mrb[2].mxu1 }
 0x1b8   : > { %v713_v27 = vmul.f32 %v2727_v22, %v690_v24  ;;  %v626_v29 = vadd.f32 %v1675_v26, %v2721_v18  ;;  %v620_v30 = vpop.f32.mrb[3].mxu1 }
 0x1b9   : > { %v712_v31 = vmul.f32 %v2727_v22, %v689_v25  ;;  %v621_v32 = vadd.f32 %v2721_v18, %v620_v30 }
 0x1ba   : > { %v692_v33 = vmax.f32 %v626_v29, 0.0  ;;  %v2743_v37 = vadd.f32 %v2734_v28, %v713_v27 }
 0x1bb   : > { %v691_v34 = vmax.f32 %v621_v32, 0.0  ;;  %v1678_v35 = vpop.f32.mrb[4].mxu1  ;;  %v2740_v36 = vadd.f32 %v2734_v28, %v712_v31 }
 0x1bc   : > { %v715_v38 = vmul.f32 %v2727_v22, %v692_v33  ;;  %v636_v39 = vadd.f32 %v1678_v35, %v2721_v18  ;;  %v630_v40 = vpop.f32.mrb[5].mxu1 }
 0x1bd   : > { %v714_v41 = vmul.f32 %v2727_v22, %v691_v34  ;;  %v631_v42 = vadd.f32 %v2721_v18, %v630_v40  ;;  %1726 = vmatprep.mubr.f32.mxu1 %v2740_v36 }
 0x1be   : > { %v694_v43 = vmax.f32 %v636_v39, 0.0  ;;  %1727 = vmatmul.mubr.f32.vlgmr.msra.gmra.mrb[16].mxu1 %v2743_v37  ;;  %v2757_v50 = vadd.f32 %v2734_v28, %v715_v38 }
 0x1bf   : > { %v693_v44 = vmax.f32 %v631_v42, 0.0  ;;  %v1681_v45 = vpop.f32.mrb[6].mxu1  ;;  %v2752_v46 = vadd.f32 %v2734_v28, %v714_v41  ;;  %v1009_v41 = vld [vmem:[#allocation10 + $0x60] sm:$0xff]  ;;  %v1010_v42 = vld [vmem:[#allocation10 + $0x68] sm:$0xff] }
 0x1c0   : > { %v717_v47 = vmul.f32 %v2727_v22, %v694_v43  ;;  %v646_v48 = vadd.f32 %v1681_v45, %v2721_v18  ;;  %v640_v49 = vpop.f32.mrb[7].mxu1  ;;  %v1950_v43 = vpack.c.bf16 %v1010_v42, %v1009_v41 }
 0x1c1   : > { %v716_v51 = vmul.f32 %v2727_v22, %v693_v44  ;;  %v641_v52 = vadd.f32 %v2721_v18, %v640_v49  ;;  %1729 = vmatprep.mubr.f32.mxu1 %v2752_v46  ;;  %v1012_v44 = vld [vmem:[#allocation10 + $0x78] sm:$0xff] }
 0x1c2   : > { %v696_v53 = vmax.f32 %v646_v48, 0.0  ;;  %1730 = vmatmul.mubr.f32.gmra.mrb[18].mxu1 %v2757_v50  ;;  %v2769_v60 = vadd.f32 %v2734_v28, %v717_v47  ;;  %1951 = vmatprep.subr.bf16.mxu0 %v1950_v43  ;;  %v751_v47 = vld [vmem:[#allocation7] sm:$0xff]  ;;  %v752_v48 = vld [vmem:[#allocation7 + $0x8] sm:$0xff] }
 0x1c3   : > { %v695_v54 = vmax.f32 %v641_v52, 0.0  ;;  %v1684_v55 = vpop.f32.mrb[8].mxu1  ;;  %v2764_v56 = vadd.f32 %v2734_v28, %v716_v51  ;;  %1953 = vmatpush3.bf16.msra.mxu0 %v1950_v43  ;;  %v1958_v49 = vpack.c.bf16 %v752_v48, %v751_v47  ;;  %v757_v43 = vld [vmem:[#allocation7 + $0x30] sm:$0xff] }
 0x1c4   : > { %v719_v57 = vmul.f32 %v2727_v22, %v696_v53  ;;  %v656_v58 = vadd.f32 %v1684_v55, %v2721_v18  ;;  %v650_v59 = vpop.f32.mrb[9].mxu1 }
 0x1c5   : > { %v718_v61 = vmul.f32 %v2727_v22, %v695_v54  ;;  %v651_v62 = vadd.f32 %v2721_v18, %v650_v59  ;;  %1732 = vmatprep.mubr.f32.mxu1 %v2764_v56  ;;  %v2838_v54 = vld [vmem:[%s3019_s25] ss:$0 sm:$0xff]  ;;  %s2281_s25 = sshll.u32 %s2365_s29, 4  ;;  %s2282_s25 = int_to_ptr.vmem [resolvable:$false] %s2281_s25 }
 0x1c6   : > { %v698_v63 = vmax.f32 %v656_v58, 0.0  ;;  %1733 = vmatmul.mubr.f32.gmra.mrb[20].mxu1 %v2769_v60  ;;  %v2781_v6 = vadd.f32 %v2734_v28, %v719_v57  ;;  %s2283_s28 = scalar_lea.vmem %s2282_s25, 4096  ;;  %p2284_p13 = scmp.lt.s32.totalorder %s2933_s7, %s2282_s25 }
 0x1c7   : > { %v697_v0 = vmax.f32 %v651_v62, 0.0  ;;  %v1687_v1 = vpop.f32.mrb[10].mxu1  ;;  %v2776_v2 = vadd.f32 %v2734_v28, %v718_v61  ;;  %p2285_p0 = scmp.lt.s32.totalorder %s2283_s28, %s2277_s17 }
 0x1c8   : > { %v721_v3 = vmul.f32 %v2727_v22, %v698_v63  ;;  %v666_v4 = vadd.f32 %v1687_v1, %v2721_v18  ;;  %v660_v5 = vpop.f32.mrb[11].mxu1 }
 0x1c9   : > { %v720_v7 = vmul.f32 %v2727_v22, %v697_v0  ;;  %v661_v8 = vadd.f32 %v2721_v18, %v660_v5  ;;  %1735 = vmatprep.mubr.f32.mxu1 %v2776_v2  ;;  %v2846_v0 = vld [vmem:[%s3020_s20] ss:$0 sm:$0xff]  ;;  %v754_v5 = vld [vmem:[#allocation7 + $0x18] sm:$0xff]  ;;  %p2286_p2 = por %p2285_p0, %p2284_p13 }
 0x1ca   : > { %v700_v9 = vmax.f32 %v666_v4, 0.0  ;;  %1736 = vmatmul.mubr.f32.gmra.mrb[22].mxu1 %v2781_v6  ;;  %v2793_v16 = vadd.f32 %v2734_v28, %v721_v3  ;;  %v753_v4 = vld [vmem:[#allocation7 + $0x10] sm:$0xff] }
 0x1cb   : > { %v699_v10 = vmax.f32 %v661_v8, 0.0  ;;  %v1690_v11 = vpop.f32.mrb[12].mxu1  ;;  %v2788_v12 = vadd.f32 %v2734_v28, %v720_v7  ;;  %p2287_p7 = pnand %p2286_p2, %p2280_p1 }
 0x1cc   : > { %v723_v13 = vmul.f32 %v2727_v22, %v700_v9  ;;  %v676_v14 = vadd.f32 %v1690_v11, %v2721_v18  ;;  %v670_v15 = vpop.f32.mrb[13].mxu1 }
 0x1cd   : > { %v722_v17 = vmul.f32 %v2727_v22, %v699_v10  ;;  %v671_v19 = vadd.f32 %v2721_v18, %v670_v15  ;;  %1738 = vmatprep.mubr.f32.mxu1 %v2788_v12 }
 0x1ce   : > { %v702_v20 = vmax.f32 %v676_v14, 0.0  ;;  %1739 = vmatmul.mubr.f32.gmra.mrb[24].mxu1 %v2793_v16  ;;  %v2805_v29 = vadd.f32 %v2734_v28, %v723_v13 }
 0x1cf   : > { %v701_v21 = vmax.f32 %v671_v19, 0.0  ;;  %v1693_v23 = vpop.f32.mrb[14].mxu1  ;;  %v2800_v24 = vadd.f32 %v2734_v28, %v722_v17  ;;  %v1962_v17 = vpack.c.bf16 %v754_v5, %v753_v4 }
 0x1d0   : > { %v725_v25 = vmul.f32 %v2727_v22, %v702_v20  ;;  %v686_v26 = vadd.f32 %v1693_v23, %v2721_v18  ;;  %v680_v27 = vpop.f32.mrb[15].mxu1  ;;  %v756_v23 = vld [vmem:[#allocation7 + $0x28] sm:$0xff] }
 0x1d1   : > { %v724_v30 = vmul.f32 %v2727_v22, %v701_v21  ;;  %v681_v31 = vadd.f32 %v2721_v18, %v680_v27  ;;  %1741 = vmatprep.mubr.f32.mxu1 %v2800_v24  ;;  %v755_v21 = vld [vmem:[#allocation7 + $0x20] sm:$0xff] }
 0x1d2   : > { %v704_v32 = vmax.f32 %v686_v26, 0.0  ;;  %1742 = vmatmul.mubr.f32.gmra.mrb[26].mxu1 %v2805_v29  ;;  %v2816_v38 = vadd.f32 %v2734_v28, %v725_v25 }
 0x1d3   : > { %v703_v33 = vmax.f32 %v681_v31, 0.0  ;;  %v2812_v34 = vadd.f32 %v2734_v28, %v724_v30 }
 0x1d4   : > { %v727_v35 = vmul.f32 %v2727_v22, %v704_v32 }
 0x1d5   : > { %v726_v39 = vmul.f32 %v2727_v22, %v703_v33  ;;  %1744 = vmatprep.mubr.f32.mxu1 %v2812_v34  ;;  %v1011_v22 = vld [vmem:[#allocation10 + $0x70] sm:$0xff] }
 0x1d6   : > { %1745 = vmatmul.mubr.f32.gmra.mrb[28].mxu1 %v2816_v38  ;;  %v2825_v40 = vadd.f32 %v2734_v28, %v727_v35  ;;  %v1954_v45 = vpack.c.bf16 %v1012_v44, %v1011_v22  ;;  %v758_v22 = vld [vmem:[#allocation7 + $0x38] sm:$0xff] }
 0x1d7   : > { %v2822_v18 = vadd.f32 %v2734_v28, %v726_v39  ;;  %v2832_v28 = vld [vmem:[%s3018_s9] ss:$0 sm:$0xff]  ;;  %v1966_v39 = vpack.c.bf16 %v756_v23, %v755_v21  ;;  %s2931_s9 = scalar_lea.hbm %s3021_s30, %s1509_s1 }
 0x1d8   : > { %1955 = vmatprep.subr.bf16.mxu0 %v1954_v45 }
 0x1d9   : > { %1747 = vmatprep.mubr.f32.mxu1 %v2822_v18  ;;  %1957 = vmatpush3.bf16.msra.mxu0 %v1954_v45 }
 0x1da   : > { %1748 = vmatmul.mubr.f32.gmra.mrb[30].mxu1 %v2825_v40  ;;  %1959 = vmatprep.subr.bf16.mxu0 %v1958_v49 }
 0x291   : > { %v1728_v51 = vpop.f32.mrb[16].mxu1 }
 0x292   : > { %v862_v52 = vadd.f32 %v1728_v51, %v2832_v28  ;;  %v856_v53 = vpop.f32.mrb[17].mxu1 }
 0x293   : > { %v857_v55 = vadd.f32 %v2832_v28, %v856_v53 }
 0x294   : > { %v936_v57 = vmax.f32 %v862_v52, 0.0 }
 0x295   : > { %v935_v58 = vmax.f32 %v857_v55, 0.0  ;;  %v1731_v59 = vpop.f32.mrb[18].mxu1  ;;  %v1970_v55 = vpack.c.bf16 %v758_v22, %v757_v43 }
 0x296   : > { %v959_v61 = vmul.f32 %v2838_v54, %v936_v57  ;;  %v872_v62 = vadd.f32 %v1731_v59, %v2832_v28  ;;  %v866_v63 = vpop.f32.mrb[19].mxu1  ;;  %v759_v59 = vld [vmem:[#allocation7 + $0x40] sm:$0xff] }
 0x297   : > { %v867_v1 = vadd.f32 %v2832_v28, %v866_v63  ;;  %v958_v3 = vmul.f32 %v2838_v54, %v935_v58 }
 0x298   : > { %v938_v7 = vmax.f32 %v872_v62, 0.0  ;;  %v982_v15 = vadd.f32 %v2846_v0, %v959_v61  ;;  %v760_v61 = vld [vmem:[#allocation7 + $0x48] sm:$0xff] }
 0x299   : > { %v937_v8 = vmax.f32 %v867_v1, 0.0  ;;  %v1734_v9 = vpop.f32.mrb[20].mxu1  ;;  %v981_v10 = vadd.f32 %v2846_v0, %v958_v3 }
 0x29a   : > { %v961_v11 = vmul.f32 %v2838_v54, %v938_v7  ;;  %v882_v13 = vadd.f32 %v1734_v9, %v2832_v28  ;;  %v876_v14 = vpop.f32.mrb[21].mxu1  ;;  %v1974_v9 = vpack.c.bf16 %v760_v61, %v759_v59 }
 0x29b   : > { %v960_v19 = vmul.f32 %v2838_v54, %v937_v8  ;;  %v877_v20 = vadd.f32 %v2832_v28, %v876_v14  ;;  %1782 = vmatprep.mubr.f32.mxu0 %v981_v10  ;;  %v762_v14 = vld [vmem:[#allocation7 + $0x58] sm:$0xff] }
 0x29c   : > { %v940_v25 = vmax.f32 %v882_v13, 0.0  ;;  %1783 = vmatmul.mubr.f32.vlgmr.msra.gmra.mrb[0].mxu0 %v982_v15  ;;  %v984_v35 = vadd.f32 %v2846_v0, %v961_v11  ;;  %v761_v13 = vld [vmem:[#allocation7 + $0x50] sm:$0xff] }
 0x29d   : > { %v939_v26 = vmax.f32 %v877_v20, 0.0  ;;  %1961 = vmatpush3.bf16.msra.mxu0 %v1958_v49  ;;  %v1737_v27 = vpop.f32.mrb[22].mxu1  ;;  %v983_v30 = vadd.f32 %v2846_v0, %v960_v19 }
 0x29e   : > { %v963_v31 = vmul.f32 %v2838_v54, %v940_v25  ;;  %v892_v32 = vadd.f32 %v1737_v27, %v2832_v28  ;;  %v886_v33 = vpop.f32.mrb[23].mxu1  ;;  %1963 = vmatprep.subr.bf16.mxu0 %v1962_v17  ;;  %v1978_v27 = vpack.c.bf16 %v762_v14, %v761_v13 }
 0x29f   : > { %v962_v41 = vmul.f32 %v2838_v54, %v939_v26  ;;  %v887_v42 = vadd.f32 %v2832_v28, %v886_v33  ;;  %1785 = vmatprep.mubr.f32.mxu0 %v983_v30  ;;  %v764_v33 = vld [vmem:[#allocation7 + $0x68] sm:$0xff] }
 0x2a0   : > { %v942_v44 = vmax.f32 %v892_v32, 0.0  ;;  %1786 = vmatmul.mubr.f32.gmra.mrb[2].mxu0 %v984_v35  ;;  %v986_v53 = vadd.f32 %v2846_v0, %v963_v31  ;;  %v763_v32 = vld [vmem:[#allocation7 + $0x60] sm:$0xff] }
 0x2a1   : > { %v941_v45 = vmax.f32 %v887_v42, 0.0  ;;  %1965 = vmatpush3.bf16.msra.mxu0 %v1962_v17  ;;  %v1740_v47 = vpop.f32.mrb[24].mxu1  ;;  %v985_v48 = vadd.f32 %v2846_v0, %v962_v41 }
 0x2a2   : > { %v965_v49 = vmul.f32 %v2838_v54, %v942_v44  ;;  %v902_v51 = vadd.f32 %v1740_v47, %v2832_v28  ;;  %v896_v52 = vpop.f32.mrb[25].mxu1  ;;  %1967 = vmatprep.subr.bf16.mxu0 %v1966_v39  ;;  %v1982_v47 = vpack.c.bf16 %v764_v33, %v763_v32 }
 0x2a3   : > { %v964_v57 = vmul.f32 %v2838_v54, %v941_v45  ;;  %v897_v58 = vadd.f32 %v2832_v28, %v896_v52  ;;  %1788 = vmatprep.mubr.f32.mxu0 %v985_v48  ;;  %v766_v52 = vld [vmem:[#allocation7 + $0x78] sm:$0xff] }
 0x2a4   : > { %v944_v62 = vmax.f32 %v902_v51, 0.0  ;;  %1789 = vmatmul.mubr.f32.gmra.mrb[4].mxu0 %v986_v53  ;;  %v988_v8 = vadd.f32 %v2846_v0, %v965_v49  ;;  %v765_v51 = vld [vmem:[#allocation7 + $0x70] sm:$0xff] }
 0x2a5   : > { %v943_v63 = vmax.f32 %v897_v58, 0.0  ;;  %1969 = vmatpush3.bf16.msra.mxu0 %v1966_v39  ;;  %v1743_v1 = vpop.f32.mrb[26].mxu1  ;;  %v987_v3 = vadd.f32 %v2846_v0, %v964_v57  ;;  %v1986_v61 = vpack.c.bf16 %v766_v52, %v765_v51 }
 0x2a6   : > { %v967_v4 = vmul.f32 %v2838_v54, %v944_v62  ;;  %v912_v5 = vadd.f32 %v1743_v1, %v2832_v28  ;;  %v906_v7 = vpop.f32.mrb[27].mxu1  ;;  %1971 = vmatprep.subr.bf16.mxu0 %v1970_v55 }
 0x2a7   : > { %v966_v10 = vmul.f32 %v2838_v54, %v943_v63  ;;  %v907_v11 = vadd.f32 %v2832_v28, %v906_v7  ;;  %1791 = vmatprep.mubr.f32.mxu0 %v987_v3 }
 0x2a8   : > { %v946_v15 = vmax.f32 %v912_v5, 0.0  ;;  %1792 = vmatmul.mubr.f32.gmra.mrb[6].mxu0 %v988_v8  ;;  %v990_v26 = vadd.f32 %v2846_v0, %v967_v4 }
 0x2a9   : > { %v945_v17 = vmax.f32 %v907_v11, 0.0  ;;  %1973 = vmatpush3.bf16.msra.mxu0 %v1970_v55  ;;  %v1746_v19 = vpop.f32.mrb[28].mxu1  ;;  %v989_v20 = vadd.f32 %v2846_v0, %v966_v10 }
 0x2aa   : > { %v969_v21 = vmul.f32 %v2838_v54, %v946_v15  ;;  %v922_v23 = vadd.f32 %v1746_v19, %v2832_v28  ;;  %v916_v25 = vpop.f32.mrb[29].mxu1  ;;  %1975 = vmatprep.subr.bf16.mxu0 %v1974_v9 }
 0x2ab   : > { %v968_v30 = vmul.f32 %v2838_v54, %v945_v17  ;;  %v917_v31 = vadd.f32 %v2832_v28, %v916_v25  ;;  %1794 = vmatprep.mubr.f32.mxu0 %v989_v20 }
 0x2ac   : > { %v948_v35 = vmax.f32 %v922_v23, 0.0  ;;  %1795 = vmatmul.mubr.f32.gmra.mrb[8].mxu0 %v990_v26  ;;  %v992_v45 = vadd.f32 %v2846_v0, %v969_v21 }
 0x2ad   : > { %v947_v39 = vmax.f32 %v917_v31, 0.0  ;;  %1977 = vmatpush3.bf16.msra.mxu0 %v1974_v9  ;;  %v1749_v41 = vpop.f32.mrb[30].mxu1  ;;  %v991_v42 = vadd.f32 %v2846_v0, %v968_v30 }
 0x2ae   : > { %v971_v43 = vmul.f32 %v2838_v54, %v948_v35  ;;  %v932_v22 = vadd.f32 %v1749_v41, %v2832_v28  ;;  %v926_v44 = vpop.f32.mrb[31].mxu1  ;;  %1979 = vmatprep.subr.bf16.mxu0 %v1978_v27 }
 0x2af   : > { %v970_v48 = vmul.f32 %v2838_v54, %v947_v39  ;;  %v927_v49 = vadd.f32 %v2832_v28, %v926_v44  ;;  %1797 = vmatprep.mubr.f32.mxu0 %v991_v42 }
 0x2b0   : > { %v950_v53 = vmax.f32 %v932_v22, 0.0  ;;  %1798 = vmatmul.mubr.f32.gmra.mrb[10].mxu0 %v992_v45  ;;  %v994_v59 = vadd.f32 %v2846_v0, %v971_v43 }
 0x2b1   : > { %v949_v55 = vmax.f32 %v927_v49, 0.0  ;;  %1981 = vmatpush3.bf16.msra.mxu0 %v1978_v27  ;;  %v993_v57 = vadd.f32 %v2846_v0, %v970_v48 }
 0x2b2   : > { %v973_v58 = vmul.f32 %v2838_v54, %v950_v53  ;;  %1983 = vmatprep.subr.bf16.mxu0 %v1982_v47 }
 0x2b3   : > { %v972_v62 = vmul.f32 %v2838_v54, %v949_v55  ;;  %1800 = vmatprep.mubr.f32.mxu0 %v993_v57 }
 0x2b4   : > { %1801 = vmatmul.mubr.f32.gmra.mrb[12].mxu0 %v994_v59  ;;  %v996_v63 = vadd.f32 %v2846_v0, %v973_v58 }
 0x2b5   : > { %1985 = vmatpush3.bf16.msra.mxu0 %v1982_v47  ;;  %v995_v28 = vadd.f32 %v2846_v0, %v972_v62 }
 0x2b6   : > { %1987 = vmatprep.subr.bf16.mxu0 %v1986_v61 }
 0x2b7   : > { %1803 = vmatprep.mubr.f32.mxu0 %v995_v28 }
 0x2b8   : > { %1804 = vmatmul.mubr.f32.gmra.mrb[14].mxu0 %v996_v63 }
 0x2b9   : > { %1989 = vmatpush3.bf16.msra.mxu0 %v1986_v61  ;;  %1838 = vmatprep.mubr.f32.mxu0 %v2740_v36  ;;  %v1502_v36 = vld [vmem:[#allocation11] ss:$0 sm:$0xff] }
 0x2bc   : > { %1839 = vmatmul.mubr.f32.vlgmr.msra.gmra.mrb[0].mxu0 %v2743_v37 }
 0x2bd   : > { %1841 = vmatprep.mubr.f32.mxu0 %v2752_v46 }
 0x2c0   : > { %1842 = vmatmul.mubr.f32.gmra.mrb[2].mxu0 %v2757_v50 }
 0x2c1   : > { %1844 = vmatprep.mubr.f32.mxu0 %v2764_v56 }
 0x2c4   : > { %1845 = vmatmul.mubr.f32.gmra.mrb[4].mxu0 %v2769_v60 }
 0x2c5   : > { %1847 = vmatprep.mubr.f32.mxu0 %v2776_v2 }
 0x2c8   : > { %1848 = vmatmul.mubr.f32.gmra.mrb[6].mxu0 %v2781_v6 }
 0x2c9   : > { %1850 = vmatprep.mubr.f32.mxu0 %v2788_v12 }
 0x2cc   : > { %1851 = vmatmul.mubr.f32.gmra.mrb[8].mxu0 %v2793_v16 }
 0x2cd   : > { %1853 = vmatprep.mubr.f32.mxu0 %v2800_v24 }
 0x2d0   : > { %1854 = vmatmul.mubr.f32.gmra.mrb[10].mxu0 %v2805_v29 }
 0x2d1   : > { %1856 = vmatprep.mubr.f32.mxu0 %v2812_v34 }
 0x2d4   : > { %1857 = vmatmul.mubr.f32.gmra.mrb[12].mxu0 %v2816_v38 }
 0x2d5   : > { %1859 = vmatprep.mubr.f32.mxu0 %v2822_v18 }
 0x2d8   : > { %1860 = vmatmul.mubr.f32.gmra.mrb[14].mxu0 %v2825_v40 }
 0x38f   : > { %v1840_v37 = vpop.f32.mrb[0].mxu0 }
 0x390   : > { %v1311_v46 = vadd.f32 %v1840_v37, %v1502_v36  ;;  %v1224_v50 = vpop.f32.mrb[1].mxu0 }
 0x391   : > { %v1310_v56 = vadd.f32 %v1502_v36, %v1224_v50 }
 0x392   : > { %1327 = vst [vmem:[%s2910_s15 + $0x8] sm:$0xff] %v1311_v46 }
 0x393   : > { %1326 = vst [vmem:[%s2910_s15] sm:$0xff] %v1310_v56  ;;  %v1843_v60 = vpop.f32.mrb[2].mxu0 }
 0x394   : > { %v1313_v2 = vadd.f32 %v1843_v60, %v1502_v36  ;;  %v1234_v6 = vpop.f32.mrb[3].mxu0 }
 0x395   : > { %v1312_v12 = vadd.f32 %v1502_v36, %v1234_v6 }
 0x396   : > { %1329 = vst [vmem:[%s2910_s15 + $0x18] sm:$0xff] %v1313_v2 }
 0x397   : > { %1328 = vst [vmem:[%s2910_s15 + $0x10] sm:$0xff] %v1312_v12  ;;  %v1846_v16 = vpop.f32.mrb[4].mxu0 }
 0x398   : > { %v1315_v24 = vadd.f32 %v1846_v16, %v1502_v36  ;;  %v1244_v29 = vpop.f32.mrb[5].mxu0 }
 0x399   : > { %v1314_v34 = vadd.f32 %v1502_v36, %v1244_v29 }
 0x39a   : > { %1331 = vst [vmem:[%s2910_s15 + $0x28] sm:$0xff] %v1315_v24 }
 0x39b   : > { %1330 = vst [vmem:[%s2910_s15 + $0x20] sm:$0xff] %v1314_v34  ;;  %v1849_v38 = vpop.f32.mrb[6].mxu0 }
 0x39c   : > { %v1317_v18 = vadd.f32 %v1849_v38, %v1502_v36  ;;  %v1254_v40 = vpop.f32.mrb[7].mxu0 }
 0x39d   : > { %v1316_v54 = vadd.f32 %v1502_v36, %v1254_v40 }
 0x39e   : > { %1333 = vst [vmem:[%s2910_s15 + $0x38] sm:$0xff] %v1317_v18 }
 0x39f   : > { %1332 = vst [vmem:[%s2910_s15 + $0x30] sm:$0xff] %v1316_v54  ;;  %v1852_v0 = vpop.f32.mrb[8].mxu0 }
 0x3a0   : > { %v1319_v1 = vadd.f32 %v1852_v0, %v1502_v36  ;;  %v1264_v3 = vpop.f32.mrb[9].mxu0 }
 0x3a1   : > { %v1318_v4 = vadd.f32 %v1502_v36, %v1264_v3 }
 0x3a2   : > { %1335 = vst [vmem:[%s2910_s15 + $0x48] sm:$0xff] %v1319_v1 }
 0x3a3   : > { %1334 = vst [vmem:[%s2910_s15 + $0x40] sm:$0xff] %v1318_v4  ;;  %v1855_v5 = vpop.f32.mrb[10].mxu0 }
 0x3a4   : > { %v1321_v7 = vadd.f32 %v1855_v5, %v1502_v36  ;;  %v1274_v8 = vpop.f32.mrb[11].mxu0 }
 0x3a5   : > { %v1320_v9 = vadd.f32 %v1502_v36, %v1274_v8 }
 0x3a6   : > { %1337 = vst [vmem:[%s2910_s15 + $0x58] sm:$0xff] %v1321_v7 }
 0x3a7   : > { %1336 = vst [vmem:[%s2910_s15 + $0x50] sm:$0xff] %v1320_v9  ;;  %v1858_v10 = vpop.f32.mrb[12].mxu0 }
 0x3a8   : > { %v1323_v11 = vadd.f32 %v1858_v10, %v1502_v36  ;;  %v1284_v13 = vpop.f32.mrb[13].mxu0 }
 0x3a9   : > { %v1322_v14 = vadd.f32 %v1502_v36, %v1284_v13 }
 0x3aa   : > { %1339 = vst [vmem:[%s2910_s15 + $0x68] sm:$0xff] %v1323_v11 }
 0x3ab   : > { %1338 = vst [vmem:[%s2910_s15 + $0x60] sm:$0xff] %v1322_v14  ;;  %v1861_v15 = vpop.f32.mrb[14].mxu0 }
 0x3ac   : > { %v1325_v17 = vadd.f32 %v1861_v15, %v1502_v36  ;;  %v1294_v19 = vpop.f32.mrb[15].mxu0 }
 0x3ad   : > { %v1324_v20 = vadd.f32 %v1502_v36, %v1294_v19 }
 0x3ae   : > { %1341 = vst [vmem:[%s2910_s15 + $0x78] sm:$0xff] %v1325_v17 }
 0x3af   : > { %1340 = vst [vmem:[%s2910_s15 + $0x70] sm:$0xff] %v1324_v20 }
 0x3b0   : > { %2290 = shalt.err (!%p2287_p7)
}
 0x3b1   : > { %s2291_s18 = scalar_lea.hbm %s2931_s9, 2048  ;;  %s2295_s1 = scalar_lea.hbm %s3021_s30, 8192 }
 0x3b2   : > { %p2292_p5 = scmp.ne.s32.totalorder %s2931_s9, %s2291_s18  ;;  %p2296_p3 = scmp.lt.u32.totalorder %s2931_s9, %s3021_s30 }
 0x3b3   : > { %p2297_p4 = scmp.lt.u32.totalorder %s2295_s1, %s2291_s18  ;;  %p2299_p6 = scmp.lt.u32.totalorder %s2291_s18, %s2931_s9 }
 0x3b4   : > { %p2293_p10 = pnand %p2292_p5, %p3022_p9 }
 0x3b5   : > { %p2298_p8 = por %p2297_p4, %p2296_p3 }
 0x3b6   : > { %p2294_p11 = pneg %p2293_p10 }
 0x3b7   : > { %p2300_p12 = por %p2299_p6, %p2298_p8 }
 0x3b9   : > { %p2301_p1 = pnand %p2300_p12, %p2294_p11 }
 0x3bb   : > { %2304 = shalt.err (!%p2301_p1)
}
 0x3bc   : > { %s2366_s17 = smov 128   ;;  %s2367_s29 = smov 8  }
 0x3bd   : > { %2028 = dma.vmem_to_hbm [thread:$0]  (%p3022_p9), %s2933_s7, 2048, %s2931_s9, %s1343_s27, %s2366_s17, %s2366_s17, %s2367_s29  }
 0x3be PF: > { %p2065_p13 = scmp.ge.s32.totalorder %s2355_s24, 2  ;;  %s1371_s25 = sand.u32 1, %s2343_s21  }
 0x3bf   : > { %p3023_p0 = scmp.ne.s32.totalorder %s3008_s14, 0  ;;  %s1372_s28 = scalar_lea.sflag [#allocation4], %s1371_s25 }
 0x3c1   : > { %p2051_p2 = pnand %p2065_p13, %p3023_p0 }
 0x3c3   : > { %2338 = dma.done.wait (!%p2051_p2), %s1372_s28, 2048  }
 0x3c4   : > { %2340 = vsyncadd (!%p2051_p2), %s1372_s28, 4294965248  ;;  %p28_p7 = scmp.ge.s32.totalorder %s2602_s13, 6   ;;  %s3024_s21 = smov %s2347_s22 }
 0x3c5   : > { %s3025_s22 = smov %s2351_s23  ;;  %s3026_s23 = smov %s2614_s12 }
 0x3c6   : > { %s3027_s24 = smov %s2602_s13  ;;  %30 = sbr.rel (!%p28_p7) target bundleno = 14 (0xe), region = 133 }
 0x3cd   :  { %1377 = vsyncpa [#allocation3], 1 }
 0x3ce   :  { %1379 = vsyncpa [#allocation3 + $0x1], 1 }
 0x3cf   :  { %1380 = vsyncpa [#allocation6], 1 }
 0x3d0   :  { %1381 = vsyncpa [#allocation9], 1 }
 0x3d1   :  { %1382 = vsyncpa [#allocation12], 1 }
 0x3d2   :  { %1383 = vsyncpa [#allocation4], 1 }
 0x3d3   :  { %1385 = vsyncpa [#allocation4 + $0x1], 1 }

</bundles_post_ra>
